<compile_context>
chip_gen: v7x
topology: tpu7x:2x2x1
jax: 0.10.0
libtpu: 0.0.40
codegen_flags: <defaults>
</compile_context>

<pallas_src>
import jax
import jax.numpy as jnp
import numpy as np
from jax import lax
from jax.experimental import pallas as pl
from jax.experimental.pallas import tpu as pltpu

POOL = 8  # kernel_size = [8, 1]


def _vmem_plan():
    """Generation-aware (input-block byte budget, vmem_limit_bytes)."""
    cap = None
    try:
        cap = int(getattr(pltpu.get_tpu_info(), "vmem_capacity_bytes"))
    except Exception:
        cap = None
    if cap is not None and cap >= 96 * (1 << 20):
        # v5e / v6e: 128 MiB physical VMEM -> large blocks, raised scoped limit
        # (scoped default is only 16 MiB on v5e / 32 MiB on v6e).
        return 4 * (1 << 20), 96 * (1 << 20)
    # v7x (64 MiB per TensorCore) or unknown: kernel 2's live set is roughly
    # 7-8x the input block (t2 in/out double-buffered + bf16 copy + two f32
    # partial results), so keep blocks at ~2 MiB and the limit at 48 MiB.
    return 2 * (1 << 20), 48 * (1 << 20)


def _pick_block_c(C, H, W, itemsize, block_bytes):
    per_channel = max(1, H * W * itemsize)
    ct = max(1, min(C, block_bytes // per_channel))
    while C % ct:
        ct -= 1
    return ct


# ---------------------------------------------------------------------------
# kernel 1: per-batch energies (accumulated over channel tiles) + per-batch
#           max / min of the energies.
# grid = (B, C // Cblk), semantics = ("parallel", "arbitrary")
# ---------------------------------------------------------------------------
def _energy_kernel(t1_ref, t2_ref, pw_ref, eh_ref, ew_ref, emax_ref, emin_ref):
    j = pl.program_id(1)
    nj = pl.num_programs(1)

    # zero-init the resident per-batch accumulators on the first channel tile,
    # then accumulate unconditionally every step (always-taken path).
    @pl.when(j == 0)
    def _():
        eh_ref[...] = jnp.zeros_like(eh_ref)
        ew_ref[...] = jnp.zeros_like(ew_ref)

    t1 = t1_ref[0]                                # (Cb, H, W)  input dtype
    t2 = t2_ref[0]                                # (Cb, H, W)
    Cb, H, W = t1.shape
    kH = H // POOL
    pw = pw_ref[...]                              # (kW, W) bf16 pooling matrix

    t2b = t2.astype(jnp.bfloat16)

    # ---- H branch -------------------------------------------------------
    # AvgPool over H as sublane-group sums on the VPU (no tiny-M MXU matmul),
    # then one batched MXU contraction; accumulated lane-dense as (kH, H).
    key_h = (t1.reshape(Cb, kH, POOL, W).sum(axis=2) * (1.0 / POOL)
             ).astype(jnp.bfloat16)               # (Cb, kH, W)
    eh_part = jnp.einsum('ckw,chw->ckh', key_h, t2b,
                         preferred_element_type=jnp.float32
                         ).sum(axis=0)            # (kH, H)

    # ---- W branch -------------------------------------------------------
    # AvgPool over W and the energy as two canonical 2-D MXU matmuls.
    t1_2d = t1.astype(jnp.bfloat16).reshape(Cb * H, W)
    t2_2d = t2b.reshape(Cb * H, W)
    key_w = lax.dot_general(pw, t1_2d, (((1,), (1,)), ((), ())),
                            preferred_element_type=jnp.float32)    # (kW, Cb*H)
    ew_part = lax.dot_general(key_w.astype(jnp.bfloat16), t2_2d,
                              (((1,), (0,)), ((), ())),
                              preferred_element_type=jnp.float32)  # (kW, W)

    eh_ref[0] = eh_ref[0] + eh_part
    ew_ref[0] = ew_ref[0] + ew_part

    @pl.when(j == nj - 1)
    def _():
        eh_acc = eh_ref[0]
        ew_acc = ew_ref[0]
        emax_ref[...] = jnp.full(
            (1, 1, 1), jnp.maximum(jnp.max(eh_acc), jnp.max(ew_acc)), jnp.float32)
        emin_ref[...] = jnp.full(
            (1, 1, 1), jnp.minimum(jnp.min(eh_acc), jnp.min(ew_acc)), jnp.float32)


# ---------------------------------------------------------------------------
# kernel 2: attention-weighted output + residual.
# The per-batch softmax is computed once (in JAX) and folded with the AvgPool
# matrices into dense operators N (H,H) and M (W,W), so each block is just two
# full-width MXU matmuls and a single lane-dense store.
# grid = (B, C // Cblk), semantics = ("parallel", "parallel")
# ---------------------------------------------------------------------------
def _attn_out_kernel(n_ref, m_ref, t2_ref, out_ref):
    t2 = t2_ref[0]                                # (Cb, H, W)
    Cb, H, W = t2.shape
    t2b = t2.astype(jnp.bfloat16)
    nmat = n_ref[0]                               # (H, H) bf16  (att_H ∘ AvgPool_H)
    mmat = m_ref[0]                               # (W, W) bf16  (AvgPool_W ∘ att_W)

    # H branch: out_H[c] = N @ t2[c]   (batched 'bqk,bkd->bqd', full-width MXU)
    n_b = jnp.broadcast_to(nmat, (Cb, H, H))
    out_h = jnp.einsum('chg,cgw->chw', n_b, t2b,
                       preferred_element_type=jnp.float32)          # (Cb, H, W)

    # W branch: out_W[c] = t2[c] @ M   (channels folded into one 2-D matmul)
    out_w = lax.dot_general(t2b.reshape(Cb * H, W), mmat,
                            (((1,), (0,)), ((), ())),
                            preferred_element_type=jnp.float32
                            ).reshape(Cb, H, W)                     # (Cb, H, W)

    # single lane-dense store of the whole block; residual add in f32
    out_ref[0] = (0.5 * (out_h + out_w) + t2.astype(jnp.float32)
                  ).astype(out_ref.dtype)


def cc_attention(tensor1, tensor2, *, block_c=None):
    B, C, H, W = tensor1.shape
    assert tensor2.shape == tensor1.shape
    assert H % POOL == 0 and W % POOL == 0, "H and W must be multiples of 8"
    kH, kW = H // POOL, W // POOL

    block_bytes, vmem_limit = _vmem_plan()
    if block_c is None:
        block_c = _pick_block_c(C, H, W, jnp.dtype(tensor1.dtype).itemsize,
                                block_bytes)
    assert C % block_c == 0
    nct = C // block_c

    # pooling matrices (AvgPool as matmul); 1/8 is exact in bf16
    ph_f = (jnp.arange(H)[None, :] // POOL == jnp.arange(kH)[:, None]
            ).astype(jnp.float32) * (1.0 / POOL)            # (kH, H)
    pw_f = (jnp.arange(W)[None, :] // POOL == jnp.arange(kW)[:, None]
            ).astype(jnp.float32) * (1.0 / POOL)            # (kW, W)
    pw_bf = pw_f.astype(jnp.bfloat16)

    # ---------------- kernel 1: energies + per-batch max/min ----------------
    eh, ew, emax_b, emin_b = pl.pallas_call(
        _energy_kernel,
        out_shape=(jax.ShapeDtypeStruct((B, kH, H), jnp.float32),
                   jax.ShapeDtypeStruct((B, kW, W), jnp.float32),
                   jax.ShapeDtypeStruct((B, 1, 1), jnp.float32),
                   jax.ShapeDtypeStruct((B, 1, 1), jnp.float32)),
        grid=(B, nct),
        in_specs=[pl.BlockSpec((1, block_c, H, W), lambda b, j: (b, j, 0, 0)),
                  pl.BlockSpec((1, block_c, H, W), lambda b, j: (b, j, 0, 0)),
                  pl.BlockSpec((kW, W), lambda b, j: (0, 0))],
        out_specs=(pl.BlockSpec((1, kH, H), lambda b, j: (b, 0, 0)),
                   pl.BlockSpec((1, kW, W), lambda b, j: (b, 0, 0)),
                   pl.BlockSpec((1, 1, 1), lambda b, j: (b, 0, 0)),
                   pl.BlockSpec((1, 1, 1), lambda b, j: (b, 0, 0))),
        compiler_params=pltpu.CompilerParams(
            dimension_semantics=("parallel", "arbitrary"),
            vmem_limit_bytes=vmem_limit),
    )(tensor1, tensor2, pw_bf)
    # TODO(synk): on v7x with B == 1 both TensorCores could be used for kernel 1
    # by adding a 2-way "parallel" split of the channel reduction (partial
    # eh/ew per core, combined in the tiny JAX step below).

    # ------- tiny global/per-batch softmax, computed ONCE in plain JAX -------
    emax = jnp.max(emax_b)
    emin = jnp.min(emin_b)
    inv_range = 1.0 / (emax - emin)        # same degenerate behavior as torch ref
    exp_h = jnp.exp((eh - emin) * inv_range)                 # (B, kH, H)
    exp_w = jnp.exp((ew - emin) * inv_range)                 # (B, kW, W)
    denom = exp_h.sum(axis=(1, 2)) + exp_w.sum(axis=(1, 2))  # (B,)
    att_h = exp_h / denom[:, None, None]   # att_H[b,h,k] stored as [b,k,h]
    att_w = exp_w / denom[:, None, None]   # att_W[b,w,k] stored as [b,k,w]

    # Fold the AvgPool into the attention weights so kernel 2 is two dense
    # full-width matmuls per block:
    #   out_H[b,c] = N[b] @ t2[b,c],   N[b,h,g] = sum_k att_H[b,h,k] * ph[k,g]
    #   out_W[b,c] = t2[b,c] @ M[b],   M[b,u,w] = sum_k pw[k,u]      * att_W[b,w,k]
    nmat = jnp.einsum('bkh,kg->bhg', att_h, ph_f).astype(jnp.bfloat16)  # (B,H,H)
    mmat = jnp.einsum('ku,bkw->buw', pw_f, att_w).astype(jnp.bfloat16)  # (B,W,W)

    # ---------------- kernel 2: attention-weighted output + residual --------
    out = pl.pallas_call(
        _attn_out_kernel,
        out_shape=jax.ShapeDtypeStruct((B, C, H, W), tensor2.dtype),
        grid=(B, nct),
        in_specs=[pl.BlockSpec((1, H, H), lambda b, j: (b, 0, 0)),
                  pl.BlockSpec((1, W, W), lambda b, j: (b, 0, 0)),
                  pl.BlockSpec((1, block_c, H, W), lambda b, j: (b, j, 0, 0))],
        out_specs=pl.BlockSpec((1, block_c, H, W), lambda b, j: (b, j, 0, 0)),
        compiler_params=pltpu.CompilerParams(
            dimension_semantics=("parallel", "parallel"),
            vmem_limit_bytes=vmem_limit),
    )(nmat, mmat, tensor2)
    return out


def cc_attention_ref(t1, t2):
    """Pure-JAX reference mirroring the PyTorch forward exactly (f32)."""
    B, C, H, W = t1.shape
    kH, kW = H // POOL, W // POOL
    key_H = t1.reshape(B, C, kH, POOL, W).mean(axis=3)       # (B,C,kH,W)
    key_W = t1.reshape(B, C, H, kW, POOL).mean(axis=4)       # (B,C,H,kW)
    val_H = t2.reshape(B, C, kH, POOL, W).mean(axis=3)
    val_W = t2.reshape(B, C, H, kW, POOL).mean(axis=4)
    query_H = jnp.transpose(t2, (0, 3, 1, 2)).reshape(B, W * C, H).transpose(0, 2, 1)
    query_W = jnp.transpose(t2, (0, 2, 1, 3)).reshape(B, H * C, W).transpose(0, 2, 1)
    keyHm = jnp.transpose(key_H, (0, 3, 1, 2)).reshape(B, W * C, kH)
    keyWm = jnp.transpose(key_W, (0, 2, 1, 3)).reshape(B, H * C, kW)
    valHm = jnp.transpose(val_H, (0, 3, 1, 2)).reshape(B, W * C, kH)
    valWm = jnp.transpose(val_W, (0, 2, 1, 3)).reshape(B, H * C, kW)
    eH = jnp.einsum('bhm,bmk->bhk', query_H, keyHm).reshape(B, H * kH)
    eW = jnp.einsum('bwm,bmk->bwk', query_W, keyWm).reshape(B, W * kW)
    energy = jnp.concatenate([eH, eW], -1)
    emax, emin = jnp.max(energy), jnp.min(energy)
    energy = (energy - emin) / (emax - emin)
    conc = jax.nn.softmax(energy, axis=-1)
    attH = conc[:, :H * kH].reshape(B, H, kH)
    attW = conc[:, H * kH:].reshape(B, W, kW)
    outH = jnp.einsum('bmk,bhk->bmh', valHm, attH).reshape(B, W, C, H).transpose(0, 2, 3, 1)
    outW = jnp.einsum('bmk,bwk->bmw', valWm, attW).reshape(B, H, C, W).transpose(0, 2, 1, 3)
    return 0.5 * (outH + outW) + t2


if __name__ == "__main__":
    key = jax.random.PRNGKey(0)
    k1, k2 = jax.random.split(key)
    B, C, H, W = 2, 4, 16, 16
    tensor1 = jax.random.normal(k1, (B, C, H, W), dtype=jnp.float32)
    tensor2 = jax.random.normal(k2, (B, C, H, W), dtype=jnp.float32)

    fn = jax.jit(cc_attention)
    out = jax.block_until_ready(fn(tensor1, tensor2))

    ref = jax.block_until_ready(cc_attention_ref(tensor1, tensor2))
    assert out.shape == (B, C, H, W)
    # bf16 MXU operands with f32 accumulation -> small numeric difference
    assert np.allclose(np.asarray(out), np.asarray(ref), rtol=2e-2, atol=2e-2), \
        "mismatch vs pure-JAX reference"

    print("KERNEL_OK")
</pallas_src>

<mosaic_0001>
module attributes {stable_mosaic.version = 11 : i64} {
  func.func @_energy_kernel(%arg0: i32, %arg1: i32, %arg2: memref<1x4x16x16xf32, #tpu.memory_space<vmem>>, %arg3: memref<1x4x16x16xf32, #tpu.memory_space<vmem>>, %arg4: memref<2x16xbf16, #tpu.memory_space<vmem>>, %arg5: memref<1x2x16xf32, #tpu.memory_space<vmem>>, %arg6: memref<1x2x16xf32, #tpu.memory_space<vmem>>, %arg7: memref<1x1x1xf32, #tpu.memory_space<vmem>>, %arg8: memref<1x1x1xf32, #tpu.memory_space<vmem>>) attributes {dimension_semantics = [#tpu.dimension_semantics<parallel>, #tpu.dimension_semantics<arbitrary>], iteration_bounds = array<i64: 2, 1>, scalar_prefetch = 0 : i64, scratch_operands = 0 : i64, tpu.core_type = #tpu.core_type<tc>, window_params = [{transform_indices = @transform_0, window_bounds = array<i64: 1, 4, 16, 16>}, {transform_indices = @transform_1, window_bounds = array<i64: 1, 4, 16, 16>}, {pipeline_mode = #tpu.pipeline_mode<synchronous>, transform_indices = @transform_2, window_bounds = array<i64: 2, 16>}, {transform_indices = @transform_3, window_bounds = array<i64: 1, 2, 16>}, {transform_indices = @transform_4, window_bounds = array<i64: 1, 2, 16>}, {transform_indices = @transform_5, window_bounds = array<i64: 1, 1, 1>}, {transform_indices = @transform_6, window_bounds = array<i64: 1, 1, 1>}]} {
    %c0_i32 = arith.constant 0 : i32
    %0 = arith.cmpi eq, %arg1, %c0_i32 : i32
    %1 = arith.extui %0 : i1 to i32
    %c0_i32_0 = arith.constant 0 : i32
    %2 = arith.cmpi ne, %1, %c0_i32_0 : i32
    scf.if %2 {
      %cst_29 = arith.constant 0.000000e+00 : f32
      %37 = vector.broadcast %cst_29 : f32 to vector<1x2x16xf32>
      %c0_30 = arith.constant 0 : index
      %c0_31 = arith.constant 0 : index
      %c0_32 = arith.constant 0 : index
      %38 = vector.load %arg5[%c0_30, %c0_31, %c0_32] : memref<1x2x16xf32, #tpu.memory_space<vmem>>, vector<1x2x16xf32>
      tpu.vector_store %arg5[%c0_30, %c0_31, %c0_32], %37 {strides = array<i32>} : memref<1x2x16xf32, #tpu.memory_space<vmem>>, vector<1x2x16xf32>,
      %cst_33 = arith.constant 0.000000e+00 : f32
      %39 = vector.broadcast %cst_33 : f32 to vector<1x2x16xf32>
      %c0_34 = arith.constant 0 : index
      %c0_35 = arith.constant 0 : index
      %c0_36 = arith.constant 0 : index
      %40 = vector.load %arg6[%c0_34, %c0_35, %c0_36] : memref<1x2x16xf32, #tpu.memory_space<vmem>>, vector<1x2x16xf32>
      tpu.vector_store %arg6[%c0_34, %c0_35, %c0_36], %39 {strides = array<i32>} : memref<1x2x16xf32, #tpu.memory_space<vmem>>, vector<1x2x16xf32>,
    } else {
    }
    %c0 = arith.constant 0 : index
    %c0_1 = arith.constant 0 : index
    %c0_2 = arith.constant 0 : index
    %c0_3 = arith.constant 0 : index
    %3 = vector.load %arg2[%c0, %c0_1, %c0_2, %c0_3] : memref<1x4x16x16xf32, #tpu.memory_space<vmem>>, vector<1x4x16x16xf32>
    %4 = vector.shape_cast %3 : vector<1x4x16x16xf32> to vector<4x16x16xf32>
    %c0_4 = arith.constant 0 : index
    %c0_5 = arith.constant 0 : index
    %c0_6 = arith.constant 0 : index
    %c0_7 = arith.constant 0 : index
    %5 = vector.load %arg3[%c0_4, %c0_5, %c0_6, %c0_7] : memref<1x4x16x16xf32, #tpu.memory_space<vmem>>, vector<1x4x16x16xf32>
    %6 = vector.shape_cast %5 : vector<1x4x16x16xf32> to vector<4x16x16xf32>
    %c0_8 = arith.constant 0 : index
    %c0_9 = arith.constant 0 : index
    %7 = vector.load %arg4[%c0_8, %c0_9] : memref<2x16xbf16, #tpu.memory_space<vmem>>, vector<2x16xbf16>
    %8 = arith.truncf %6 : vector<4x16x16xf32> to vector<4x16x16xbf16>
    %9 = vector.shape_cast %4 : vector<4x16x16xf32> to vector<4x2x8x16xf32>
    %cst = arith.constant dense<0.000000e+00> : vector<4x2x16xf32>
    %10 = vector.multi_reduction <add>, %9, %cst [2] : vector<4x2x8x16xf32> to vector<4x2x16xf32>
    %cst_10 = arith.constant 1.250000e-01 : f32
    %11 = vector.broadcast %cst_10 : f32 to vector<4x2x16xf32>
    %12 = arith.mulf %10, %11 : vector<4x2x16xf32>
    %13 = arith.truncf %12 : vector<4x2x16xf32> to vector<4x2x16xbf16>
    "tpu.trace_start"() <{level = 10 : i32, message = "ckw,chw->ckh"}> : () -> ()
    %cst_11 = arith.constant dense<0.000000e+00> : vector<4x2x16xf32>
    %14 = tpu.matmul %13, %8, %cst_11 {dimension_numbers = #tpu.dot_dimension_numbers<[2], [2], [1], [1], [0, 0, 0, 1, 1, 1], [0], [0]>} : vector<4x2x16xbf16>, vector<4x16x16xbf16>, vector<4x2x16xf32> -> vector<4x2x16xf32>
    "tpu.trace_stop"() : () -> ()
    %cst_12 = arith.constant dense<0.000000e+00> : vector<2x16xf32>
    %15 = vector.multi_reduction <add>, %14, %cst_12 [0] : vector<4x2x16xf32> to vector<2x16xf32>
    %16 = arith.truncf %4 : vector<4x16x16xf32> to vector<4x16x16xbf16>
    %17 = vector.shape_cast %16 : vector<4x16x16xbf16> to vector<64x16xbf16>
    %18 = vector.shape_cast %8 : vector<4x16x16xbf16> to vector<64x16xbf16>
    %cst_13 = arith.constant dense<0.000000e+00> : vector<2x64xf32>
    %19 = tpu.matmul %7, %17, %cst_13 {dimension_numbers = #tpu.dot_dimension_numbers<[1], [1], [0], [0], [0, 0, 1, 0], [], []>} : vector<2x16xbf16>, vector<64x16xbf16>, vector<2x64xf32> -> vector<2x64xf32>
    %20 = arith.truncf %19 : vector<2x64xf32> to vector<2x64xbf16>
    %cst_14 = arith.constant dense<0.000000e+00> : vector<2x16xf32>
    %21 = tpu.matmul %20, %18, %cst_14 {dimension_numbers = #tpu.dot_dimension_numbers<[1], [0], [0], [1], [0, 0, 1, 1], [], []>} : vector<2x64xbf16>, vector<64x16xbf16>, vector<2x16xf32> -> vector<2x16xf32>
    %c0_15 = arith.constant 0 : index
    %c0_16 = arith.constant 0 : index
    %c0_17 = arith.constant 0 : index
    %22 = vector.load %arg5[%c0_15, %c0_16, %c0_17] : memref<1x2x16xf32, #tpu.memory_space<vmem>>, vector<1x2x16xf32>
    %23 = vector.shape_cast %22 : vector<1x2x16xf32> to vector<2x16xf32>
    %24 = arith.addf %23, %15 : vector<2x16xf32>
    %c0_18 = arith.constant 0 : index
    %c0_19 = arith.constant 0 : index
    %c0_20 = arith.constant 0 : index
    %25 = vector.load %arg5[%c0_18, %c0_19, %c0_20] : memref<1x2x16xf32, #tpu.memory_space<vmem>>, vector<1x2x16xf32>
    %26 = vector.shape_cast %25 : vector<1x2x16xf32> to vector<2x16xf32>
    %27 = vector.shape_cast %24 : vector<2x16xf32> to vector<1x2x16xf32>
    tpu.vector_store %arg5[%c0_18, %c0_19, %c0_20], %27 {strides = array<i32>} : memref<1x2x16xf32, #tpu.memory_space<vmem>>, vector<1x2x16xf32>,
    %c0_21 = arith.constant 0 : index
    %c0_22 = arith.constant 0 : index
    %c0_23 = arith.constant 0 : index
    %28 = vector.load %arg6[%c0_21, %c0_22, %c0_23] : memref<1x2x16xf32, #tpu.memory_space<vmem>>, vector<1x2x16xf32>
    %29 = vector.shape_cast %28 : vector<1x2x16xf32> to vector<2x16xf32>
    %30 = arith.addf %29, %21 : vector<2x16xf32>
    %c0_24 = arith.constant 0 : index
    %c0_25 = arith.constant 0 : index
    %c0_26 = arith.constant 0 : index
    %31 = vector.load %arg6[%c0_24, %c0_25, %c0_26] : memref<1x2x16xf32, #tpu.memory_space<vmem>>, vector<1x2x16xf32>
    %32 = vector.shape_cast %31 : vector<1x2x16xf32> to vector<2x16xf32>
    %33 = vector.shape_cast %30 : vector<2x16xf32> to vector<1x2x16xf32>
    tpu.vector_store %arg6[%c0_24, %c0_25, %c0_26], %33 {strides = array<i32>} : memref<1x2x16xf32, #tpu.memory_space<vmem>>, vector<1x2x16xf32>,
    %c0_i32_27 = arith.constant 0 : i32
    %34 = arith.cmpi eq, %arg1, %c0_i32_27 : i32
    %35 = arith.extui %34 : i1 to i32
    %c0_i32_28 = arith.constant 0 : i32
    %36 = arith.cmpi ne, %35, %c0_i32_28 : i32
    scf.if %36 {
      %c0_29 = arith.constant 0 : index
      %c0_30 = arith.constant 0 : index
      %c0_31 = arith.constant 0 : index
      %37 = vector.load %arg5[%c0_29, %c0_30, %c0_31] : memref<1x2x16xf32, #tpu.memory_space<vmem>>, vector<1x2x16xf32>
      %38 = vector.shape_cast %37 : vector<1x2x16xf32> to vector<2x16xf32>
      %c0_32 = arith.constant 0 : index
      %c0_33 = arith.constant 0 : index
      %c0_34 = arith.constant 0 : index
      %39 = vector.load %arg6[%c0_32, %c0_33, %c0_34] : memref<1x2x16xf32, #tpu.memory_space<vmem>>, vector<1x2x16xf32>
      %40 = vector.shape_cast %39 : vector<1x2x16xf32> to vector<2x16xf32>
      %41 = vector.shape_cast %38 : vector<2x16xf32> to vector<1x2x16xf32>
      %cst_35 = arith.constant dense<0xFF800000> : vector<1xf32>
      %42 = vector.multi_reduction <maximumf>, %41, %cst_35 [1, 2] : vector<1x2x16xf32> to vector<1xf32>
      %43 = vector.shape_cast %42 : vector<1xf32> to vector<1x1x1xf32>
      %44 = vector.extract %43[0, 0, 0] : f32 from vector<1x1x1xf32>
      %45 = vector.shape_cast %40 : vector<2x16xf32> to vector<1x2x16xf32>
      %cst_36 = arith.constant dense<0xFF800000> : vector<1xf32>
      %46 = vector.multi_reduction <maximumf>, %45, %cst_36 [1, 2] : vector<1x2x16xf32> to vector<1xf32>
      %47 = vector.shape_cast %46 : vector<1xf32> to vector<1x1x1xf32>
      %48 = vector.extract %47[0, 0, 0] : f32 from vector<1x1x1xf32>
      %49 = arith.maximumf %44, %48 : f32
      %50 = vector.broadcast %49 : f32 to vector<1x1x1xf32>
      %c0_37 = arith.constant 0 : index
      %c0_38 = arith.constant 0 : index
      %c0_39 = arith.constant 0 : index
      %51 = vector.load %arg7[%c0_37, %c0_38, %c0_39] : memref<1x1x1xf32, #tpu.memory_space<vmem>>, vector<1x1x1xf32>
      tpu.vector_store %arg7[%c0_37, %c0_38, %c0_39], %50 {strides = array<i32>} : memref<1x1x1xf32, #tpu.memory_space<vmem>>, vector<1x1x1xf32>,
      %52 = vector.shape_cast %38 : vector<2x16xf32> to vector<1x2x16xf32>
      %cst_40 = arith.constant dense<0x7F800000> : vector<1xf32>
      %53 = vector.multi_reduction <minimumf>, %52, %cst_40 [1, 2] : vector<1x2x16xf32> to vector<1xf32>
      %54 = vector.shape_cast %53 : vector<1xf32> to vector<1x1x1xf32>
      %55 = vector.extract %54[0, 0, 0] : f32 from vector<1x1x1xf32>
      %56 = vector.shape_cast %40 : vector<2x16xf32> to vector<1x2x16xf32>
      %cst_41 = arith.constant dense<0x7F800000> : vector<1xf32>
      %57 = vector.multi_reduction <minimumf>, %56, %cst_41 [1, 2] : vector<1x2x16xf32> to vector<1xf32>
      %58 = vector.shape_cast %57 : vector<1xf32> to vector<1x1x1xf32>
      %59 = vector.extract %58[0, 0, 0] : f32 from vector<1x1x1xf32>
      %60 = arith.minimumf %55, %59 : f32
      %61 = vector.broadcast %60 : f32 to vector<1x1x1xf32>
      %c0_42 = arith.constant 0 : index
      %c0_43 = arith.constant 0 : index
      %c0_44 = arith.constant 0 : index
      %62 = vector.load %arg8[%c0_42, %c0_43, %c0_44] : memref<1x1x1xf32, #tpu.memory_space<vmem>>, vector<1x1x1xf32>
      tpu.vector_store %arg8[%c0_42, %c0_43, %c0_44], %61 {strides = array<i32>} : memref<1x1x1xf32, #tpu.memory_space<vmem>>, vector<1x1x1xf32>,
    } else {
    }
    return
  }
  func.func @transform_0(%arg0: i32, %arg1: i32) -> (i32, i32, i32, i32) {
    %c0_i32 = arith.constant 0 : i32
    %c0_i32_0 = arith.constant 0 : i32
    %c0_i32_1 = arith.constant 0 : i32
    return %arg0, %arg1, %c0_i32, %c0_i32_0 : i32, i32, i32, i32
  }
  func.func @transform_1(%arg0: i32, %arg1: i32) -> (i32, i32, i32, i32) {
    %c0_i32 = arith.constant 0 : i32
    %c0_i32_0 = arith.constant 0 : i32
    %c0_i32_1 = arith.constant 0 : i32
    return %arg0, %arg1, %c0_i32, %c0_i32_0 : i32, i32, i32, i32
  }
  func.func @transform_2(%arg0: i32, %arg1: i32) -> (i32, i32) {
    %c0_i32 = arith.constant 0 : i32
    %c0_i32_0 = arith.constant 0 : i32
    %c0_i32_1 = arith.constant 0 : i32
    return %c0_i32, %c0_i32_0 : i32, i32
  }
  func.func @transform_3(%arg0: i32, %arg1: i32) -> (i32, i32, i32) {
    %c0_i32 = arith.constant 0 : i32
    %c0_i32_0 = arith.constant 0 : i32
    %c0_i32_1 = arith.constant 0 : i32
    return %arg0, %c0_i32, %c0_i32_0 : i32, i32, i32
  }
  func.func @transform_4(%arg0: i32, %arg1: i32) -> (i32, i32, i32) {
    %c0_i32 = arith.constant 0 : i32
    %c0_i32_0 = arith.constant 0 : i32
    %c0_i32_1 = arith.constant 0 : i32
    return %arg0, %c0_i32, %c0_i32_0 : i32, i32, i32
  }
  func.func @transform_5(%arg0: i32, %arg1: i32) -> (i32, i32, i32) {
    %c0_i32 = arith.constant 0 : i32
    %c0_i32_0 = arith.constant 0 : i32
    %c0_i32_1 = arith.constant 0 : i32
    return %arg0, %c0_i32, %c0_i32_0 : i32, i32, i32
  }
  func.func @transform_6(%arg0: i32, %arg1: i32) -> (i32, i32, i32) {
    %c0_i32 = arith.constant 0 : i32
    %c0_i32_0 = arith.constant 0 : i32
    %c0_i32_1 = arith.constant 0 : i32
    return %arg0, %c0_i32, %c0_i32_0 : i32, i32, i32
  }
}

module attributes {stable_mosaic.version = 11 : i64} {
  func.func @_attn_out_kernel(%arg0: i32, %arg1: i32, %arg2: memref<1x16x16xbf16, #tpu.memory_space<vmem>>, %arg3: memref<1x16x16xbf16, #tpu.memory_space<vmem>>, %arg4: memref<1x4x16x16xf32, #tpu.memory_space<vmem>>, %arg5: memref<1x4x16x16xf32, #tpu.memory_space<vmem>>) attributes {dimension_semantics = [#tpu.dimension_semantics<parallel>, #tpu.dimension_semantics<parallel>], iteration_bounds = array<i64: 2, 1>, scalar_prefetch = 0 : i64, scratch_operands = 0 : i64, tpu.core_type = #tpu.core_type<tc>, window_params = [{transform_indices = @transform_0, window_bounds = array<i64: 1, 16, 16>}, {transform_indices = @transform_1, window_bounds = array<i64: 1, 16, 16>}, {transform_indices = @transform_2, window_bounds = array<i64: 1, 4, 16, 16>}, {transform_indices = @transform_3, window_bounds = array<i64: 1, 4, 16, 16>}]} {
    %c0 = arith.constant 0 : index
    %c0_0 = arith.constant 0 : index
    %c0_1 = arith.constant 0 : index
    %c0_2 = arith.constant 0 : index
    %0 = vector.load %arg4[%c0, %c0_0, %c0_1, %c0_2] : memref<1x4x16x16xf32, #tpu.memory_space<vmem>>, vector<1x4x16x16xf32>
    %1 = vector.shape_cast %0 : vector<1x4x16x16xf32> to vector<4x16x16xf32>
    %2 = arith.truncf %1 : vector<4x16x16xf32> to vector<4x16x16xbf16>
    %c0_3 = arith.constant 0 : index
    %c0_4 = arith.constant 0 : index
    %c0_5 = arith.constant 0 : index
    %3 = vector.load %arg2[%c0_3, %c0_4, %c0_5] : memref<1x16x16xbf16, #tpu.memory_space<vmem>>, vector<1x16x16xbf16>
    %4 = vector.shape_cast %3 : vector<1x16x16xbf16> to vector<16x16xbf16>
    %c0_6 = arith.constant 0 : index
    %c0_7 = arith.constant 0 : index
    %c0_8 = arith.constant 0 : index
    %5 = vector.load %arg3[%c0_6, %c0_7, %c0_8] : memref<1x16x16xbf16, #tpu.memory_space<vmem>>, vector<1x16x16xbf16>
    %6 = vector.shape_cast %5 : vector<1x16x16xbf16> to vector<16x16xbf16>
    %7 = vector.shape_cast %4 : vector<16x16xbf16> to vector<1x16x16xbf16>
    %8 = vector.broadcast %7 : vector<1x16x16xbf16> to vector<4x16x16xbf16>
    "tpu.trace_start"() <{level = 10 : i32, message = "chg,cgw->chw"}> : () -> ()
    %cst = arith.constant dense<0.000000e+00> : vector<4x16x16xf32>
    %9 = tpu.matmul %8, %2, %cst {dimension_numbers = #tpu.dot_dimension_numbers<[2], [1], [1], [2], [0, 0, 0, 1, 1, 2], [0], [0]>} : vector<4x16x16xbf16>, vector<4x16x16xbf16>, vector<4x16x16xf32> -> vector<4x16x16xf32>
    "tpu.trace_stop"() : () -> ()
    %10 = vector.shape_cast %2 : vector<4x16x16xbf16> to vector<64x16xbf16>
    %cst_9 = arith.constant dense<0.000000e+00> : vector<64x16xf32>
    %11 = tpu.matmul %10, %6, %cst_9 {dimension_numbers = #tpu.dot_dimension_numbers<[1], [0], [0], [1], [0, 0, 1, 1], [], []>} : vector<64x16xbf16>, vector<16x16xbf16>, vector<64x16xf32> -> vector<64x16xf32>
    %12 = vector.shape_cast %11 : vector<64x16xf32> to vector<4x16x16xf32>
    %13 = arith.addf %9, %12 : vector<4x16x16xf32>
    %cst_10 = arith.constant 5.000000e-01 : f32
    %14 = vector.broadcast %cst_10 : f32 to vector<4x16x16xf32>
    %15 = arith.mulf %14, %13 : vector<4x16x16xf32>
    %16 = arith.addf %15, %1 : vector<4x16x16xf32>
    %c0_11 = arith.constant 0 : index
    %c0_12 = arith.constant 0 : index
    %c0_13 = arith.constant 0 : index
    %c0_14 = arith.constant 0 : index
    %17 = vector.load %arg5[%c0_11, %c0_12, %c0_13, %c0_14] : memref<1x4x16x16xf32, #tpu.memory_space<vmem>>, vector<1x4x16x16xf32>
    %18 = vector.shape_cast %17 : vector<1x4x16x16xf32> to vector<4x16x16xf32>
    %19 = vector.shape_cast %16 : vector<4x16x16xf32> to vector<1x4x16x16xf32>
    tpu.vector_store %arg5[%c0_11, %c0_12, %c0_13, %c0_14], %19 {strides = array<i32>} : memref<1x4x16x16xf32, #tpu.memory_space<vmem>>, vector<1x4x16x16xf32>,
    return
  }
  func.func @transform_0(%arg0: i32, %arg1: i32) -> (i32, i32, i32) {
    %c0_i32 = arith.constant 0 : i32
    %c0_i32_0 = arith.constant 0 : i32
    %c0_i32_1 = arith.constant 0 : i32
    return %arg0, %c0_i32, %c0_i32_0 : i32, i32, i32
  }
  func.func @transform_1(%arg0: i32, %arg1: i32) -> (i32, i32, i32) {
    %c0_i32 = arith.constant 0 : i32
    %c0_i32_0 = arith.constant 0 : i32
    %c0_i32_1 = arith.constant 0 : i32
    return %arg0, %c0_i32, %c0_i32_0 : i32, i32, i32
  }
  func.func @transform_2(%arg0: i32, %arg1: i32) -> (i32, i32, i32, i32) {
    %c0_i32 = arith.constant 0 : i32
    %c0_i32_0 = arith.constant 0 : i32
    %c0_i32_1 = arith.constant 0 : i32
    return %arg0, %arg1, %c0_i32, %c0_i32_0 : i32, i32, i32, i32
  }
  func.func @transform_3(%arg0: i32, %arg1: i32) -> (i32, i32, i32, i32) {
    %c0_i32 = arith.constant 0 : i32
    %c0_i32_0 = arith.constant 0 : i32
    %c0_i32_1 = arith.constant 0 : i32
    return %arg0, %arg1, %c0_i32, %c0_i32_0 : i32, i32, i32, i32
  }
}

</mosaic_0001>

<bundles_post_ra>
// kernel: cc_attention.3
= control target key start
LH: loop header
LB: loop body
LE: loop exit
PB: predicated region body
PF: predicated region fallthrough
CT: control target
= control target key end

     0   :  { %8 = vsyncpa [#allocation3], 0  ;;  %s1079_s0 = inlined_call_operand.vmem [shape: bf16[2,16,16], index: 0, kind: input, shape index: {}]   ;;  %s1080_s1 = inlined_call_operand.vmem [shape: bf16[2,16,16], index: 1, kind: input, shape index: {}]   ;;  %s1081_s2 = inlined_call_operand.vmem [shape: f32[2,4,16,16], index: 2, kind: input, shape index: {}]   ;;  %s1082_s3 = inlined_call_operand.hbm [shape: f32[2,4,16,16], index: 3, kind: output, shape index: {}]  }
   0x1   :  { %10 = vsyncpa [#allocation3 + $0x1], 0  ;;  %s907_s12 = smov 0   ;;  %s909_s13 = smov 0  }
   0x2   :  { %s911_s14 = smov 0   ;;  %s913_s15 = smov 0  }
   0x3   :  { %s915_s16 = smov 0   ;;  %s917_s17 = smov 0  }
   0x4 LB: > { %s663_s18 = sadd.s32 4294967295, %s880_s17   ;;  %s664_s19 = sadd.s32 4294967294, %s880_s17   ;;  %s880_s17 = sphi %s917_s17, %s16_s17   ;;  %s876_s16 = sphi %s915_s16, %s1089_s16   ;;  %s872_s15 = sphi %s913_s15, %s1088_s15   ;;  %s868_s14 = sphi %s911_s14, %s1087_s14   ;;  %s864_s13 = sphi %s909_s13, %s1086_s13   ;;  %s860_s12 = sphi %s907_s12, %s1085_s12  }
   0x5   : > { %s28_s20 = sadd.s32 1, %s876_s16  ;;  %s117_s21 = sadd.s32 1, %s868_s14 }
   0x6   : > { %p30_p0 = scmp.ge.s32.totalorder %s28_s20, 2  ;;  %p127_p1 = scmp.ne.s32.totalorder %s868_s14, %s864_s13 }
   0x7   : > { %p128_p2 = scmp.eq.s32.totalorder %s663_s18, 1  ;;  %p133_p3 = scmp.ne.s32.totalorder %s864_s13, %s860_s12 }
   0x8   : > { %s1091_s20 = smov (%p30_p0, %s28_s20), 0  ;;  %p134_p5 = scmp.eq.s32.totalorder %s664_s19, 1 }
   0x9   : > { %p947_p4 = por %p128_p2, %p127_p1  ;;  %s112_s23 = ssub.s32 %s876_s16, %s1091_s20 }
   0xa   : > { %p667_p6 = scmp.ge.s32.totalorder %s880_s17, 1  ;;  %p115_p7 = scmp.eq.s32.totalorder %s112_s23, 0 }
   0xb   : > { %p954_p8 = por %p134_p5, %p133_p3  ;;  %p182_p9 = scmp.lt.s32.totalorder %s880_s17, 3 }
   0xc   : > { %s960_s25 = scalar_select %p115_p7, %s868_s14, %s117_s21  }
   0xd   : > { %p183_p10 = pnand %p667_p6, %p182_p9 }
   0xe   : > { %p221_p11 = scmp.lt.s32.totalorder (!%p183_p10), %s872_s15, 1  ;;  %v882_v0 = vmov (!%p183_p10), 0.0   ;;  %vm883_vm0 = vmmov (!%p183_p10), 0   ;;  %vm266_vm1 = vcmask (!%p183_p10), 130048   ;;  %s218_s11 = sand.u32 (!%p183_p10), 1, %s864_s13  }
   0xf   : > { %186 = sbr.rel (%p183_p10) target bundleno = 284 (0x11c), region = 32  ;;  %717 = vmatprep.subr.bf16.mxu1 (!%p183_p10), %v882_v0  ;;  %719 = vmatprep.mubr.msk.bf16.mxu1 (!%p183_p10), %vm883_vm0, %v882_v0  ;;  %s668_s18 = sshll.u32 (!%p183_p10), %s218_s11, 6 }
  0x10   : > { %s1000_s19 = scalar_lea.vmem (!%p183_p10), [#allocation2], %s668_s18  ;;  %s693_s21 = sshll.u32 (!%p183_p10), %s872_s15, 10 }
  0x11   : > { %s557_s23 = sshll.u32 (!%p183_p10), %s1000_s19, 4  ;;  %s884_s30 = smov (!%p183_p10), [#allocation2]   ;;  %s1022_s23 = int_to_ptr.vmem [resolvable:$true] %s557_s23 }
  0x12   : > { %s802_s29 = scalar_lea.vmem (!%p183_p10), %s1022_s23, 1024 }
  0x13   : > { %p803_p12 = scmp.ne.s32.totalorder (!%p183_p10), %s1022_s23, %s802_s29 }
  0x15   : > { %p804_p13 = pnand (!%p183_p10), %p803_p12, %p947_p4 }
  0x16   : > { %s222_s26 = scalar_select %p221_p11, %s872_s15, 1 }
  0x17   : > { %s1033_s15 = scalar_lea.sflag [#allocation3], %s218_s11  ;;  %p805_p0 = pneg %p804_p13 }
  0x18   : > { %s690_s27 = sshll.u32 %s222_s26, 3  ;;  %s692_s28 = sshll.u32 %s222_s26, 6 }
  0x19   : > { %s225_s4 = scalar_lea.vmem %s1079_s0, %s690_s27  ;;  %s230_s7 = scalar_lea.vmem %s1080_s1, %s690_s27 }
  0x1a   : > { %s240_s10 = scalar_lea.vmem %s1081_s2, %s692_s28  ;;  %v800_v1 = vld [vmem:[%s230_s7] sm:$0xff]   ;;  %s1020_s28 = scalar_lea.hbm %s1082_s3, %s693_s21 }
  0x1b   : > { %v244_v2 = vld [vmem:[%s240_s10] sm:$0xff]  ;;  %v245_v3 = vld [vmem:[%s240_s10 + $0x8] sm:$0xff]  ;;  %v246_v4 = vld [vmem:[%s240_s10 + $0x10] sm:$0xff]  ;;  %707 = vmatprep.subr.bf16.mxu0 %v800_v1 }
  0x1c   : > { %v252_v5 = vpack.c.bf16 %v245_v3, %v244_v2  ;;  %v247_v6 = vld [vmem:[%s240_s10 + $0x18] sm:$0xff]  ;;  %v974_v7 = vld [vmem:[%s240_s10 + $0x20] sm:$0xff]  ;;  %v976_v8 = vld [vmem:[%s240_s10 + $0x28] sm:$0xff]  ;;  %708 = vmatpush3.bf16.msra.mxu0 %v800_v1 }
  0x1d   : > { %v801_v9 = vld [vmem:[%s225_s4] sm:$0xff]   ;;  %v253_v10 = vpack.c.bf16 %v247_v6, %v246_v4  ;;  %729 = vmatprep.subr.bf16.mxu0 %v882_v0  ;;  %v254_v11 = vpack.c.bf16 %v976_v8, %v974_v7  ;;  %v983_v12 = vld [vmem:[%s240_s10 + $0x30] sm:$0xff]  ;;  %v985_v13 = vld [vmem:[%s240_s10 + $0x38] sm:$0xff]  ;;  %s806_s4 = sshll.u32 %s884_s30, 4  ;;  %s807_s4 = int_to_ptr.vmem [resolvable:$false] %s806_s4 }
  0x1e   : > { %718 = vmatpush3.bf16.msra.mxu1 %v252_v5  ;;  %709 = vmatprep.mubr.msk.bf16.mxu0 %vm266_vm1, %v252_v5  ;;  %v255_v14 = vpack.c.bf16 %v985_v13, %v983_v12  ;;  %s808_s5 = scalar_lea.vmem %s807_s4, 2048  ;;  %p809_p1 = scmp.lt.s32.totalorder %s1022_s23, %s807_s4 }
  0x1f   : > { %723 = vmatprep.subr.bf16.mxu1 %v882_v0  ;;  %710 = vmatmul.mubr.msk.bf16.vlgmr.msra.gmra.mrb[0].mxu0 %vm266_vm1, %v253_v10  ;;  %p810_p2 = scmp.lt.s32.totalorder %s808_s5, %s802_s29 }
  0x20   : > { %730 = vmatpush3.bf16.msra.mxu0 %v254_v11  ;;  %713 = vmatprep.mubr.msk.bf16.mxu0 %vm266_vm1, %v254_v11 }
  0x21   : > { %720 = vmatmul.mubr.msk.bf16.vlgmr.msra.gmra.mrb[0].mxu1 %vm266_vm1, %v801_v9  ;;  %p811_p3 = por %p810_p2, %p809_p1 }
  0x22   : > { %724 = vmatpush3.bf16.msra.mxu1 %v253_v10  ;;  %725 = vmatprep.mubr.msk.bf16.mxu1 %vm883_vm0, %v882_v0 }
  0x23   : > { %735 = vmatprep.subr.bf16.mxu1 %v882_v0  ;;  %p812_p5 = pnand %p811_p3, %p805_p0 }
  0x27   : > { %714 = vmatmul.mubr.msk.bf16.gmra.mrb[4].mxu0 %vm266_vm1, %v255_v14 }
  0x28   : > { %731 = vmatprep.mubr.msk.bf16.mxu0 %vm883_vm0, %v882_v0 }
  0x29   : > { %726 = vmatmul.mubr.msk.bf16.vlgmr.msra.gmra.mrb[4].mxu1 %vm266_vm1, %v801_v9 }
  0x2a   : > { %736 = vmatpush3.bf16.msra.mxu1 %v255_v14  ;;  %737 = vmatprep.mubr.msk.bf16.mxu1 %vm883_vm0, %v882_v0 }
  0x2f   : > { %732 = vmatmul.mubr.msk.bf16.vlgmr.msra.gmra.mrb[8].mxu0 %vm266_vm1, %v801_v9 }
  0x31   : > { %738 = vmatmul.mubr.msk.bf16.vlgmr.msra.gmra.mrb[8].mxu1 %vm266_vm1, %v801_v9 }
  0xf2   : > { %v711_v15 = vpop.f32.mrb[0].mxu0 }
  0xf3   : > { %v313_v17 = vpop.f32.mrb[1].mxu0 }
  0xf4   : > { %v386_v16 = vpop.f32.mrb[0].mxu1  ;;  %v712_v20 = vpop.f32.mrb[2].mxu0 }
  0xf5   : > { %v721_v18 = vpop.f32.mrb[1].mxu1  ;;  %v387_v19 = vadd.f32 %v386_v16, %v313_v17  ;;  %v316_v22 = vpop.f32.mrb[3].mxu0 }
  0xf6   : > { %v389_v21 = vpop.f32.mrb[2].mxu1 }
  0xf7   : > { %v516_v23 = vmul.f32 0.5, %v387_v19  ;;  %v722_v24 = vpop.f32.mrb[3].mxu1  ;;  %v390_v25 = vadd.f32 %v389_v21, %v316_v22 }
  0xf9   : > { %v524_v26 = vadd.f32 %v516_v23, %v244_v2  ;;  %v517_v27 = vmul.f32 0.5, %v390_v25 }
  0xfa   : > { %v715_v29 = vpop.f32.mrb[4].mxu0 }
  0xfb   : > { %532 = vst.msk [vmem:[%s1000_s19] sm:$0xff] %vm266_vm1, %v524_v26  ;;  %v525_v28 = vadd.f32 %v517_v27, %v245_v3  ;;  %v329_v31 = vpop.f32.mrb[5].mxu0 }
  0xfc   : > { %v427_v30 = vpop.f32.mrb[4].mxu1  ;;  %v716_v34 = vpop.f32.mrb[6].mxu0 }
  0xfd   : > { %533 = vst.msk [vmem:[%s1000_s19 + $0x8] sm:$0xff] %vm266_vm1, %v525_v28  ;;  %v428_v32 = vadd.f32 %v711_v15, %v427_v30  ;;  %v727_v33 = vpop.f32.mrb[5].mxu1  ;;  %v332_v36 = vpop.f32.mrb[7].mxu0 }
  0xfe   : > { %v430_v35 = vpop.f32.mrb[6].mxu1 }
  0xff   : > { %v518_v37 = vmul.f32 0.5, %v428_v32  ;;  %v431_v38 = vadd.f32 %v712_v20, %v430_v35  ;;  %v728_v39 = vpop.f32.mrb[7].mxu1 }
 0x101   : > { %v526_v40 = vadd.f32 %v518_v37, %v246_v4  ;;  %v519_v41 = vmul.f32 0.5, %v431_v38 }
 0x102   : > { %v468_v43 = vpop.f32.mrb[8].mxu0 }
 0x103   : > { %534 = vst.msk [vmem:[%s1000_s19 + $0x10] sm:$0xff] %vm266_vm1, %v526_v40  ;;  %v527_v42 = vadd.f32 %v519_v41, %v247_v6  ;;  %v469_v45 = vadd.f32 %v468_v43, %v329_v31  ;;  %v733_v46 = vpop.f32.mrb[9].mxu0 }
 0x104   : > { %v509_v44 = vpop.f32.mrb[8].mxu1  ;;  %v471_v49 = vpop.f32.mrb[10].mxu0 }
 0x105   : > { %535 = vst.msk [vmem:[%s1000_s19 + $0x18] sm:$0xff] %vm266_vm1, %v527_v42  ;;  %v510_v47 = vadd.f32 %v715_v29, %v509_v44  ;;  %v739_v48 = vpop.f32.mrb[9].mxu1  ;;  %v520_v50 = vmul.f32 0.5, %v469_v45  ;;  %v472_v52 = vadd.f32 %v471_v49, %v332_v36  ;;  %v734_v53 = vpop.f32.mrb[11].mxu0 }
 0x106   : > { %v512_v51 = vpop.f32.mrb[10].mxu1 }
 0x107   : > { %v522_v54 = vmul.f32 0.5, %v510_v47  ;;  %v513_v55 = vadd.f32 %v716_v34, %v512_v51  ;;  %v740_v56 = vpop.f32.mrb[11].mxu1  ;;  %v528_v57 = vadd.f32 %v520_v50, %v974_v7  ;;  %v521_v58 = vmul.f32 0.5, %v472_v52 }
 0x109   : > { %v530_v59 = vadd.f32 %v522_v54, %v983_v12  ;;  %v523_v60 = vmul.f32 0.5, %v513_v55  ;;  %536 = vst.msk [vmem:[%s1000_s19 + $0x20] sm:$0xff] %vm266_vm1, %v528_v57  ;;  %v529_v61 = vadd.f32 %v521_v58, %v976_v8 }
 0x10b   : > { %538 = vst.msk [vmem:[%s1000_s19 + $0x30] sm:$0xff] %vm266_vm1, %v530_v59  ;;  %v531_v62 = vadd.f32 %v523_v60, %v985_v13  ;;  %537 = vst.msk [vmem:[%s1000_s19 + $0x28] sm:$0xff] %vm266_vm1, %v529_v61 }
 0x10d   : > { %539 = vst.msk [vmem:[%s1000_s19 + $0x38] sm:$0xff] %vm266_vm1, %v531_v62 }
 0x10e   : > { %815 = shalt.err (!%p812_p5)
}
 0x10f   : > { %s816_s6 = scalar_lea.hbm %s1020_s28, 1024  ;;  %s820_s9 = scalar_lea.hbm %s1082_s3, 2048 }
 0x110   : > { %p817_p6 = scmp.ne.s32.totalorder %s1020_s28, %s816_s6  ;;  %p821_p10 = scmp.lt.u32.totalorder %s1020_s28, %s1082_s3 }
 0x111   : > { %p822_p11 = scmp.lt.u32.totalorder %s820_s9, %s816_s6  ;;  %p824_p13 = scmp.lt.u32.totalorder %s816_s6, %s1020_s28 }
 0x112   : > { %p818_p7 = pnand %p817_p6, %p947_p4 }
 0x113   : > { %p823_p12 = por %p822_p11, %p821_p10 }
 0x114   : > { %p819_p9 = pneg %p818_p7 }
 0x115   : > { %p825_p0 = por %p824_p13, %p823_p12 }
 0x117   : > { %p826_p1 = pnand %p825_p0, %p819_p9 }
 0x119   : > { %829 = shalt.err (!%p826_p1)
}
 0x11a   : > { %s885_s18 = smov 128   ;;  %s886_s19 = smov 8  }
 0x11b   : > { %741 = dma.vmem_to_hbm [thread:$0]  (%p947_p4), %s1022_s23, 1024, %s1020_s28, %s1033_s15, %s885_s18, %s885_s18, %s886_s19  }
 0x11c PF: > { %p747_p2 = scmp.ge.s32.totalorder %s880_s17, 2  ;;  %s572_s21 = sand.u32 1, %s860_s12  }
 0x11d   : > { %s573_s26 = scalar_lea.sflag [#allocation3], %s572_s21 }
 0x11e   : > { %p744_p3 = pnand %p747_p2, %p954_p8 }
 0x120   : > { %855 = dma.done.wait (!%p744_p3), %s573_s26, 1024  }
 0x121   : > { %857 = vsyncadd (!%p744_p3), %s573_s26, 4294966272  ;;  %s16_s17 = sadd.s32 1, %s880_s17   ;;  %s1085_s12 = smov %s864_s13 }
 0x122   : > { %p13_p5 = scmp.ge.s32.totalorder %s16_s17, 4   ;;  %s1086_s13 = smov %s868_s14 }
 0x123   : > { %s1087_s14 = smov %s960_s25  ;;  %s1088_s15 = smov %s876_s16 }
 0x124   : > { %s1089_s16 = smov %s1091_s20  ;;  %15 = sbr.rel (!%p13_p5) target bundleno = 4 (0x4), region = 73 }
 0x12b   :  { %578 = vsyncpa [#allocation3], 1 }
 0x12c   :  { %580 = vsyncpa [#allocation3 + $0x1], 1 }

// kernel: cc_attention.2
= control target key start
LH: loop header
LB: loop body
LE: loop exit
PB: predicated region body
PF: predicated region fallthrough
CT: control target
= control target key end

     0   :  { %12 = vsyncpa [#allocation3], 0  ;;  %s1677_s0 = inlined_call_operand.hbm [shape: f32[2,4,16,16], index: 0, kind: input, shape index: {}]   ;;  %s1678_s1 = inlined_call_operand.hbm [shape: f32[2,4,16,16], index: 1, kind: input, shape index: {}]   ;;  %s1679_s2 = inlined_call_operand.vmem [shape: bf16[2,16], index: 2, kind: input, shape index: {}]   ;;  %s1680_s3 = inlined_call_operand.vmem [shape: f32[2,2,16], index: 3, kind: output, shape index: {0}]   ;;  %s1681_s4 = inlined_call_operand.vmem [shape: f32[2,2,16], index: 4, kind: output, shape index: {1}]   ;;  %s1682_s5 = inlined_call_operand.vmem [shape: f32[2,1,1], index: 5, kind: output, shape index: {2}]   ;;  %s1683_s6 = inlined_call_operand.vmem [shape: f32[2,1,1], index: 6, kind: output, shape index: {3}]  }
   0x1   :  { %14 = vsyncpa [#allocation3 + $0x1], 0 }
   0x2   :  { %15 = vsyncpa [#allocation5], 0 }
   0x3   :  { %17 = vsyncpa [#allocation5 + $0x1], 0  ;;  %s1345_s21 = smov 0   ;;  %s1347_s22 = smov 0  }
   0x4   :  { %s1349_s23 = smov 0   ;;  %s1351_s24 = smov 0  }
   0x5   :  { %s1353_s25 = smov 0   ;;  %s1355_s26 = smov 0  }
   0x6 LB: > { %s1025_s27 = sadd.s32 4294967295, %s1302_s26   ;;  %s35_s28 = sadd.s32 1, %s1298_s25  ;;  %s1302_s26 = sphi %s1355_s26, %s23_s26   ;;  %s1298_s25 = sphi %s1353_s25, %s1694_s25   ;;  %s1294_s24 = sphi %s1351_s24, %s1693_s24   ;;  %s1290_s23 = sphi %s1349_s23, %s1692_s23   ;;  %s1286_s22 = sphi %s1347_s22, %s1691_s22   ;;  %s1282_s21 = sphi %s1345_s21, %s1690_s21  }
   0x7   : > { %p37_p0 = scmp.ge.s32.totalorder %s35_s28, 2  ;;  %s44_s29 = sadd.s32 1, %s1290_s23 }
   0x8   : > { %p51_p1 = scmp.ne.s32.totalorder %s1290_s23, %s1286_s22  ;;  %p52_p2 = scmp.eq.s32.totalorder %s1302_s26, 0 }
   0x9   : > { %s1696_s28 = smov (%p37_p0, %s35_s28), 0  ;;  %p57_p4 = scmp.ne.s32.totalorder %s1286_s22, %s1282_s21 }
   0xa   : > { %p1381_p3 = por %p52_p2, %p51_p1  ;;  %s39_s7 = ssub.s32 %s1298_s25, %s1696_s28 }
   0xb   : > { %p58_p5 = scmp.eq.s32.totalorder %s1025_s27, 0  ;;  %p42_p6 = scmp.eq.s32.totalorder %s39_s7, 0 }
   0xc   : > { %p1135_p8 = scmp.lt.s32.totalorder %s1302_s26, 2  ;;  %s1397_s10 = sand.u32 1, %s1290_s23  }
   0xd   : > { %p1388_p7 = por %p58_p5, %p57_p4  ;;  %s1048_s11 = sshll.u32 %s1298_s25, 10 }
   0xe   : > { %s1394_s9 = scalar_select %p42_p6, %s1290_s23, %s44_s29  }
   0xf   : > { %s1686_s8 = scalar_select %p1388_p7, 1, 0 }
  0x10   : > { %s1029_s12 = sshll.u32 %s1397_s10, 6  ;;  %s1406_s15 = scalar_lea.hbm %s1677_s0, %s1048_s11 }
  0x11   : > { %s241_s16 = scalar_lea.vmem [#allocation2], %s1029_s12  ;;  %p1412_p9 = pnand %p1135_p8, %p1381_p3 }
  0x12   : > { %s251_s17 = sshll.u32 %s241_s16, 4  ;;  %s238_s19 = scalar_lea.sflag [#allocation3], %s1397_s10  ;;  %s1416_s17 = int_to_ptr.vmem [resolvable:$true] %s251_s17 }
  0x13   : > { %s1188_s20 = scalar_lea.hbm %s1406_s15, 1024  ;;  %p1190_p11 = pneg %p1412_p9 }
  0x14   : > { %p1189_p10 = scmp.ne.s32.totalorder %s1406_s15, %s1188_s20  ;;  %s1193_s29 = scalar_lea.hbm %s1677_s0, 2048 }
  0x15   : > { %p1194_p0 = scmp.lt.u32.totalorder %s1406_s15, %s1677_s0  ;;  %p1195_p1 = scmp.lt.u32.totalorder %s1193_s29, %s1188_s20 }
  0x16   : > { %p1191_p12 = pnand %p1190_p11, %p1189_p10  ;;  %p1197_p3 = scmp.lt.u32.totalorder %s1188_s20, %s1406_s15 }
  0x17   : > { %p1196_p2 = por %p1195_p1, %p1194_p0 }
  0x18   : > { %p1192_p13 = pneg %p1191_p12 }
  0x19   : > { %p1198_p4 = por %p1197_p3, %p1196_p2 }
  0x1b   : > { %p1199_p5 = pnand %p1198_p4, %p1192_p13 }
  0x1d   : > { %1202 = shalt.err (!%p1199_p5)
}
  0x1e   : > { %s1203_s13 = scalar_lea.vmem %s1416_s17, 1024  ;;  %s1304_s14 = smov [#allocation2]  }
  0x1f   : > { %p1204_p6 = scmp.ne.s32.totalorder %s1416_s17, %s1203_s13  ;;  %s1208_s16 = sshll.u32 %s1304_s14, 4  ;;  %s1209_s16 = int_to_ptr.vmem [resolvable:$false] %s1208_s16 }
  0x20   : > { %s1210_s21 = scalar_lea.vmem %s1209_s16, 2048  ;;  %p1211_p12 = scmp.lt.s32.totalorder %s1416_s17, %s1209_s16 }
  0x21   : > { %p1206_p8 = pnand %p1204_p6, %p1190_p11  ;;  %p1212_p0 = scmp.lt.s32.totalorder %s1210_s21, %s1203_s13 }
  0x23   : > { %p1207_p10 = pneg %p1206_p8  ;;  %p1213_p1 = por %p1212_p0, %p1211_p12 }
  0x25   : > { %p1214_p2 = pnand %p1213_p1, %p1207_p10 }
  0x27   : > { %1217 = shalt.err (!%p1214_p2)
}
  0x28   : > { %s1305_s20 = smov 128   ;;  %s1306_s27 = smov 8  }
  0x29   : > { %1131 = dma.hbm_to_vmem [thread:$0]  (!%p1412_p9), %s1406_s15, 1024, %s1416_s17, %s238_s19, %s1305_s20, %s1305_s20, %s1306_s27  }
  0x2a   : > { %p1035_p13 = scmp.ge.s32.totalorder %s1302_s26, 1  ;;  %p283_p3 = scmp.lt.s32.totalorder %s1302_s26, 3 }
  0x2b   : > { %s1460_s13 = scalar_lea.hbm %s1678_s1, %s1048_s11  ;;  %s265_s14 = scalar_lea.vmem [#allocation4], %s1029_s12 }
  0x2c   : > { %p1451_p4 = pnand %p1035_p13, %p283_p3  ;;  %s275_s16 = sshll.u32 %s265_s14, 4  ;;  %s1464_s16 = int_to_ptr.vmem [resolvable:$true] %s275_s16 }
  0x2d   : > { %s262_s15 = scalar_lea.sflag [#allocation5], %s1397_s10  ;;  %s1218_s17 = scalar_lea.hbm %s1460_s13, 1024 }
  0x2e   : > { %p1219_p5 = scmp.ne.s32.totalorder %s1460_s13, %s1218_s17  ;;  %s1223_s11 = scalar_lea.hbm %s1678_s1, 2048 }
  0x2f   : > { %p1224_p10 = scmp.lt.u32.totalorder %s1460_s13, %s1678_s1  ;;  %p1225_p12 = scmp.lt.u32.totalorder %s1223_s11, %s1218_s17 }
  0x30   : > { %p1221_p6 = pnand %p1219_p5, %p1190_p11  ;;  %p1227_p1 = scmp.lt.u32.totalorder %s1218_s17, %s1460_s13 }
  0x31   : > { %p1226_p0 = por %p1225_p12, %p1224_p10 }
  0x32   : > { %p1222_p8 = pneg %p1221_p6 }
  0x33   : > { %p1228_p2 = por %p1227_p1, %p1226_p0 }
  0x35   : > { %p1229_p13 = pnand %p1228_p2, %p1222_p8 }
  0x37   : > { %1232 = shalt.err (!%p1229_p13)
}
  0x38   : > { %s1233_s12 = scalar_lea.vmem %s1464_s16, 1024  ;;  %s1307_s14 = smov [#allocation4]  }
  0x39   : > { %p1234_p3 = scmp.ne.s32.totalorder %s1464_s16, %s1233_s12  ;;  %s1238_s19 = sshll.u32 %s1307_s14, 4  ;;  %s1239_s19 = int_to_ptr.vmem [resolvable:$false] %s1238_s19 }
  0x3a   : > { %s1240_s21 = scalar_lea.vmem %s1239_s19, 2048  ;;  %p1241_p7 = scmp.lt.s32.totalorder %s1464_s16, %s1239_s19 }
  0x3b   : > { %p1236_p5 = pnand %p1234_p3, %p1190_p11  ;;  %p1242_p10 = scmp.lt.s32.totalorder %s1240_s21, %s1233_s12 }
  0x3d   : > { %p1237_p6 = pneg %p1236_p5  ;;  %p1243_p12 = por %p1242_p10, %p1241_p7 }
  0x3f   : > { %p1244_p0 = pnand %p1243_p12, %p1237_p6 }
  0x41   : > { %1247 = shalt.err (!%p1244_p0)
}
  0x42   : > { %1134 = dma.hbm_to_vmem [thread:$0]  (!%p1412_p9), %s1460_s13, 1024, %s1464_s16, %s262_s15, %s1305_s20, %s1305_s20, %s1306_s27  }
  0x43   : > { %287 = sbr.rel (%p1451_p4) target bundleno = 782 (0x30e), region = 32  ;;  %s289_s17 = sand.u32 (!%p1451_p4), 1, %s1286_s22  }
  0x44   : > { %s1036_s11 = sshll.u32 (!%p1451_p4), %s289_s17, 6  ;;  %s290_s30 = scalar_lea.sflag (!%p1451_p4), [#allocation3], %s289_s17 }
  0x45   : > { %s1498_s7 = scalar_lea.vmem (!%p1451_p4), [#allocation2], %s1036_s11  ;;  %p1689_p7 = scmp.ne.s32.totalorder (!%p1451_p4), %s1686_s8, 0 }
  0x4a   : > { %1273 = dma.done.wait (%p1689_p7), %s290_s30, 1024  }
  0x4b   : > { %1275 = vsyncadd (%p1689_p7), %s290_s30, 4294966272  ;;  %s299_s10 = scalar_lea.sflag [#allocation5], %s289_s17  ;;  %s1504_s18 = scalar_lea.vmem [#allocation4], %s1036_s11 }
  0x4c   : > { %1277 = dma.done.wait (%p1689_p7), %s299_s10, 1024  }
  0x4d   : > { %1279 = vsyncadd (%p1689_p7), %s299_s10, 4294966272  ;;  %v1308_v0 = vmov 0.0   ;;  %vm1309_vm0 = vmmov 0   ;;  %vm390_vm1 = vcmask 130048   ;;  %v381_v1 = vld [vmem:[%s1504_s18 + $0x20] sm:$0xff]  ;;  %v382_v2 = vld [vmem:[%s1504_s18 + $0x28] sm:$0xff] }
  0x4e   : > { %1080 = vmatprep.subr.bf16.mxu0 %v1308_v0  ;;  %1068 = vmatprep.subr.bf16.mxu1 %v1308_v0  ;;  %v377_v3 = vld [vmem:[%s1504_s18] sm:$0xff]  ;;  %v1519_v4 = vpack.c.bf16 %v382_v2, %v381_v1  ;;  %v378_v5 = vld [vmem:[%s1504_s18 + $0x8] sm:$0xff]  ;;  %v1545_v17 = vld [vmem:[%s1498_s7 + $0x10] sm:$0xff]  ;;  %vm467_vm2 = vcmask 1041409   ;;  %p347_p9 = scmp.lt.s32.totalorder %s1294_s24, 1  ;;  %vm366_vm3 = vcmask 123904  }
  0x4f   : > { %1070 = vmatprep.mubr.msk.bf16.mxu1 %vm1309_vm0, %v1308_v0  ;;  %1082 = vmatprep.mubr.msk.bf16.mxu0 %vm1309_vm0, %v1308_v0  ;;  %v1523_v6 = vld [vmem:[%s1498_s7] sm:$0xff]  ;;  %v1526_v7 = vld [vmem:[%s1498_s7 + $0x8] sm:$0xff]  ;;  %v1528_v8 = vpack.c.bf16 %v378_v5, %v377_v3  ;;  %v1552_v21 = vld [vmem:[%s1498_s7 + $0x18] sm:$0xff]  ;;  %v405_v26 = vsel %vm390_vm1, %v1545_v17, 0.0  ;;  %vm740_vm4 = vcmask 523264   ;;  %vm817_vm5 = vcmask 0  }
  0x50   : > { %v391_v9 = vsel %vm390_vm1, %v1523_v6, 0.0  ;;  %v398_v10 = vsel %vm390_vm1, %v1526_v7, 0.0  ;;  %v1535_v11 = vld [vmem:[%s1498_s7 + $0x20] sm:$0xff]  ;;  %v1538_v12 = vld [vmem:[%s1498_s7 + $0x28] sm:$0xff]  ;;  %v578_v13 = vsel %vm390_vm1, %v1519_v4, 0  ;;  %v412_v27 = vsel %vm390_vm1, %v1552_v21, 0.0 }
  0x51   : > { %v392_v14 = vrot.slane %v391_v9, 4  ;;  %v399_v15 = vrot.slane %v398_v10, 4  ;;  %v419_v16 = vsel %vm390_vm1, %v1535_v11, 0.0  ;;  %1081 = vmatpush3.bf16.xpose.msra.mxu0 %v578_v13  ;;  %v474_v18 = vsel %vm390_vm1, %v1528_v8, 0  ;;  %v1561_v31 = vld [vmem:[%s1498_s7 + $0x30] sm:$0xff]  ;;  %v380_v34 = vld [vmem:[%s1504_s18 + $0x18] sm:$0xff] }
  0x52   : > { %v420_v19 = vrot.slane %v419_v16, 4  ;;  %v426_v20 = vsel %vm390_vm1, %v1538_v12, 0.0  ;;  %1069 = vmatpush3.bf16.xpose.msra.mxu1 %v474_v18  ;;  %1092 = vmatprep.subr.bf16.mxu0 %v1308_v0  ;;  %v379_v33 = vld [vmem:[%s1504_s18 + $0x10] sm:$0xff]  ;;  %v406_v35 = vrot.slane %v405_v26, 4  ;;  %v413_v36 = vrot.slane %v412_v27, 4  ;;  %v1568_v44 = vld [vmem:[%s1498_s7 + $0x38] sm:$0xff] }
  0x53   : > { %v393_v22 = vadd.f32 %v392_v14, %v391_v9  ;;  %v400_v23 = vadd.f32 %v399_v15, %v398_v10  ;;  %v427_v24 = vrot.slane %v426_v20, 4  ;;  %1074 = vmatprep.subr.bf16.mxu1 %v1308_v0  ;;  %v680_v40 = vpack.c.bf16 %v1526_v7, %v1523_v6  ;;  %s1698_s24 = smov (!%p347_p9, %s1294_s24), 1 }
  0x54   : > { %v421_v25 = vadd.f32 %v420_v19, %v419_v16  ;;  %v407_v42 = vadd.f32 %v406_v35, %v405_v26  ;;  %v414_v43 = vadd.f32 %v413_v36, %v412_v27  ;;  %v433_v45 = vsel %vm390_vm1, %v1561_v31, 0.0  ;;  %s1038_s27 = sshll.u32 %s1698_s24, 1  ;;  %s357_s11 = scalar_lea.vmem %s1682_s5, %s1698_s24 }
  0x55   : > { %v394_v28 = vrot.slane %v393_v22, 2  ;;  %v401_v29 = vrot.slane %v400_v23, 2  ;;  %v428_v30 = vadd.f32 %v427_v24, %v426_v20  ;;  %v1572_v49 = vpack.c.bf16 %v380_v34, %v379_v33  ;;  %s350_s16 = scalar_lea.vmem %s1680_s3, %s1038_s27  ;;  %s354_s14 = scalar_lea.vmem %s1681_s4, %s1038_s27 }
  0x56   : > { %v422_v32 = vrot.slane %v421_v25, 2  ;;  %v408_v51 = vrot.slane %v407_v42, 2  ;;  %v415_v52 = vrot.slane %v414_v43, 2  ;;  %v434_v53 = vrot.slane %v433_v45, 4  ;;  %367 = vst.msk [vmem:[%s350_s16] sm:$0x3] %vm366_vm3, %v1308_v0  ;;  %s360_s20 = scalar_lea.vmem %s1683_s6, %s1698_s24 }
  0x57   : > { %v395_v37 = vadd.f32 %v394_v28, %v393_v22  ;;  %v402_v38 = vadd.f32 %v401_v29, %v400_v23  ;;  %v429_v39 = vrot.slane %v428_v30, 2  ;;  %v440_v57 = vsel %vm390_vm1, %v1568_v44, 0.0  ;;  %368 = vst.msk [vmem:[%s354_s14] sm:$0x3] %vm366_vm3, %v1308_v0 }
  0x58   : > { %v423_v41 = vadd.f32 %v422_v32, %v421_v25  ;;  %v409_v59 = vadd.f32 %v408_v51, %v407_v42  ;;  %v416_v60 = vadd.f32 %v415_v52, %v414_v43  ;;  %v435_v61 = vadd.f32 %v434_v53, %v433_v45  ;;  %v384_v42 = vld [vmem:[%s1504_s18 + $0x38] sm:$0xff] }
  0x59   : > { %v396_v46 = vrot.slane %v395_v37, 1  ;;  %v403_v47 = vrot.slane %v402_v38, 1  ;;  %v430_v48 = vadd.f32 %v429_v39, %v428_v30  ;;  %v441_v2 = vrot.slane %v440_v57, 4 }
  0x5a   : > { %v424_v50 = vrot.slane %v423_v41, 1  ;;  %v410_v5 = vrot.slane %v409_v59, 1  ;;  %v417_v6 = vrot.slane %v416_v60, 1  ;;  %v436_v7 = vrot.slane %v435_v61, 2 }
  0x5b   : > { %v397_v54 = vadd.f32 %v396_v46, %v395_v37  ;;  %v404_v55 = vadd.f32 %v403_v47, %v402_v38  ;;  %v431_v56 = vrot.slane %v430_v48, 1  ;;  %v442_v14 = vadd.f32 %v441_v2, %v440_v57 }
  0x5c   : > { %v425_v58 = vadd.f32 %v424_v50, %v423_v41  ;;  %v411_v16 = vadd.f32 %v410_v5, %v409_v59  ;;  %v418_v18 = vadd.f32 %v417_v6, %v416_v60  ;;  %v437_v19 = vadd.f32 %v436_v7, %v435_v61  ;;  %v383_v41 = vld [vmem:[%s1504_s18 + $0x30] sm:$0xff] }
  0x5d   : > { %v447_v62 = vmul.f32 0.125, %v397_v54  ;;  %v448_v63 = vmul.f32 0.125, %v404_v55  ;;  %v432_v1 = vadd.f32 %v431_v56, %v430_v48  ;;  %v443_v24 = vrot.slane %v442_v14, 2 }
  0x5e   : > { %v451_v3 = vmul.f32 0.125, %v425_v58  ;;  %v449_v26 = vmul.f32 0.125, %v411_v16  ;;  %v450_v27 = vmul.f32 0.125, %v418_v18  ;;  %v438_v28 = vrot.slane %v437_v19, 1 }
  0x5f   : > { %v455_v9 = vpack.c.bf16 %v447_v62, %v447_v62  ;;  %v456_v10 = vpack.c.bf16 %v448_v63, %v448_v63  ;;  %v452_v13 = vmul.f32 0.125, %v432_v1  ;;  %v526_v32 = vsel %vm390_vm1, %v1572_v49, 0 }
  0x60   : > { %v459_v15 = vpack.c.bf16 %v451_v3, %v451_v3  ;;  %v444_v33 = vadd.f32 %v443_v24, %v442_v14  ;;  %v457_v35 = vpack.c.bf16 %v449_v26, %v449_v26  ;;  %v458_v36 = vpack.c.bf16 %v450_v27, %v450_v27 }
  0x61   : > { %v465_v20 = vunpack.c.l.b16 %v455_v9  ;;  %v466_v22 = vunpack.c.l.b16 %v456_v10  ;;  %v460_v23 = vpack.c.bf16 %v452_v13, %v452_v13  ;;  %v439_v37 = vadd.f32 %v438_v28, %v437_v19 }
  0x62   : > { %v570_v25 = vunpack.c.l.b16 %v459_v15  ;;  %v688_v39 = vsel %vm390_vm1, %v680_v40, 0  ;;  %v445_v43 = vrot.slane %v444_v33, 1  ;;  %v518_v46 = vunpack.c.l.b16 %v457_v35 }
  0x63   : > { %v468_v29 = vsel %vm467_vm2, %v466_v22, %v465_v20  ;;  %v571_v30 = vunpack.c.l.b16 %v460_v23  ;;  %v519_v47 = vunpack.c.l.b16 %v458_v36  ;;  %v453_v48 = vmul.f32 0.125, %v439_v37  ;;  %v784_v20 = vld [vmem:[%s350_s16] sm:$0x3] }
  0x64   : > { %v469_v34 = vpack.c.b16 %v468_v29, %v468_v29  ;;  %v446_v50 = vadd.f32 %v445_v43, %v444_v33  ;;  %v389_v40 = vpack.c.bf16 %v384_v42, %v383_v41  ;;  %v681_v55 = vpack.c.bf16 %v1552_v21, %v1545_v17 }
  0x65   : > { %v572_v38 = vsel %vm467_vm2, %v571_v30, %v570_v25  ;;  %v520_v51 = vsel %vm467_vm2, %v519_v47, %v518_v46  ;;  %v461_v52 = vpack.c.bf16 %v453_v48, %v453_v48  ;;  %v682_v21 = vpack.c.bf16 %v1538_v12, %v1535_v11 }
  0x66   : > { %1071 = vmatmul.mubr.msk.bf16.vlgmr.msra.gmra.mrb[0].mxu1 %vm390_vm1, %v469_v34  ;;  %v573_v45 = vpack.c.b16 %v572_v38, %v572_v38  ;;  %v454_v53 = vmul.f32 0.125, %v446_v50  ;;  %v521_v54 = vpack.c.b16 %v520_v51, %v520_v51  ;;  %v630_v58 = vsel %vm390_vm1, %v389_v40, 0 }
  0x67   : > { %1075 = vmatpush3.bf16.xpose.msra.mxu1 %v526_v32  ;;  %1076 = vmatprep.mubr.msk.bf16.mxu1 %vm1309_vm0, %v1308_v0  ;;  %v622_v57 = vunpack.c.l.b16 %v461_v52  ;;  %v691_v60 = vsel %vm390_vm1, %v681_v55, 0  ;;  %v694_v62 = vsel %vm390_vm1, %v682_v21, 0  ;;  %v683_v63 = vpack.c.bf16 %v1568_v44, %v1561_v31 }
  0x68   : > { %1083 = vmatmul.mubr.msk.bf16.vlgmr.msra.gmra.mrb[0].mxu0 %vm390_vm1, %v573_v45  ;;  %1086 = vmatprep.subr.bf16.mxu1 %v1308_v0  ;;  %v462_v56 = vpack.c.bf16 %v454_v53, %v454_v53  ;;  %v787_v45 = vld [vmem:[%s354_s14] sm:$0x3] }
  0x69   : > { %1093 = vmatpush3.bf16.xpose.msra.mxu0 %v688_v39  ;;  %1100 = vmatprep.mubr.msk.bf16.mxu0 %vm1309_vm0, %v1308_v0  ;;  %v697_v11 = vsel %vm390_vm1, %v683_v63, 0 }
  0x6a   : > { %1094 = vmatprep.subr.bf16.mxu0 %v1308_v0  ;;  %v623_v59 = vunpack.c.l.b16 %v462_v56 }
  0x6c   : > { %v624_v61 = vsel %vm467_vm2, %v623_v59, %v622_v57 }
  0x6d   : > { %v625_v17 = vpack.c.b16 %v624_v61, %v624_v61 }
  0x6e   : > { %1077 = vmatmul.mubr.msk.bf16.vlgmr.msra.gmra.mrb[4].mxu1 %vm390_vm1, %v521_v54 }
  0x6f   : > { %1087 = vmatpush3.bf16.xpose.msra.mxu1 %v630_v58  ;;  %1088 = vmatprep.mubr.msk.bf16.mxu1 %vm1309_vm0, %v1308_v0 }
  0x70   : > { %1104 = vmatprep.subr.bf16.mxu1 %v1308_v0 }
  0x71   : > { %1095 = vmatpush3.bf16.xpose.msra.mxu0 %v691_v60 }
  0x72   : > { %1096 = vmatprep.subr.bf16.mxu0 %v1308_v0 }
  0x76   : > { %1089 = vmatmul.mubr.msk.bf16.vlgmr.msra.gmra.mrb[8].mxu1 %vm390_vm1, %v625_v17 }
  0x77   : > { %1105 = vmatpush3.bf16.msra.mxu1 %v1528_v8  ;;  %1112 = vmatprep.mubr.msk.bf16.mxu1 %vm1309_vm0, %v1308_v0  ;;  %v385_v8 = vld [vmem:[%s1679_s2] sm:$0x1] }
  0x78   : > { %1106 = vmatprep.subr.bf16.mxu1 %v1308_v0 }
  0x79   : > { %1097 = vmatpush3.bf16.xpose.msra.mxu0 %v694_v62 }
  0x7a   : > { %1098 = vmatprep.subr.bf16.mxu0 %v1308_v0 }
  0x7b   : > { %1107 = vmatpush3.bf16.msra.mxu1 %v1572_v49 }
  0x7c   : > { %1108 = vmatprep.subr.bf16.mxu1 %v1308_v0 }
  0x7f   : > { %1109 = vmatpush3.bf16.msra.mxu1 %v1519_v4 }
  0x80   : > { %1110 = vmatprep.subr.bf16.mxu1 %v1308_v0 }
  0x81   : > { %1099 = vmatpush3.bf16.xpose.msra.mxu0 %v697_v11 }
  0x83   : > { %1111 = vmatpush3.bf16.msra.mxu1 %v389_v40 }
  0x88   : > { %1101 = vmatmul.mubr.msk.bf16.vlgmr.msra.gmra.mrb[4].mxu0 %vm390_vm1, %v385_v8 }
 0x139   : > { %v510_v4 = vpop.f32.mrb[0].mxu1 }
 0x13a   : > { %v1072_v12 = vpop.f32.mrb[1].mxu1  ;;  %v673_v5 = vsel %vm366_vm3, %v510_v4, 0.0 }
 0x13b   : > { %v614_v31 = vpop.f32.mrb[0].mxu0  ;;  %v513_v44 = vpop.f32.mrb[2].mxu1 }
 0x13c   : > { %v1084_v49 = vpop.f32.mrb[1].mxu0  ;;  %v1073_v1 = vpop.f32.mrb[3].mxu1  ;;  %v676_v14 = vsel %vm366_vm3, %v614_v31, 0.0 }
 0x13d   : > { %v617_v2 = vpop.f32.mrb[2].mxu0 }
 0x13e   : > { %v1085_v3 = vpop.f32.mrb[3].mxu0 }
 0x141   : > { %v562_v6 = vpop.f32.mrb[4].mxu1 }
 0x142   : > { %v674_v7 = vsel %vm366_vm3, %v562_v6, 0.0  ;;  %v1078_v9 = vpop.f32.mrb[5].mxu1 }
 0x143   : > { %v675_v10 = vadd.f32 %v674_v7, %v673_v5  ;;  %v565_v13 = vpop.f32.mrb[6].mxu1 }
 0x144   : > { %v1079_v15 = vpop.f32.mrb[7].mxu1 }
 0x145   : > { %v677_v16 = vadd.f32 %v676_v14, %v675_v10 }
 0x149   : > { %v666_v18 = vpop.f32.mrb[8].mxu1 }
 0x14a   : > { %v678_v19 = vsel %vm366_vm3, %v666_v18, 0.0  ;;  %v1090_v22 = vpop.f32.mrb[9].mxu1 }
 0x14b   : > { %v679_v23 = vadd.f32 %v678_v19, %v677_v16  ;;  %v669_v24 = vpop.f32.mrb[10].mxu1 }
 0x14c   : > { %v1091_v25 = vpop.f32.mrb[11].mxu1 }
 0x14d   : > { %v785_v26 = vadd.f32 %v784_v20, %v679_v23 }
 0x14f   : > { %786 = vst.msk [vmem:[%s350_s16] sm:$0x3] %vm366_vm3, %v785_v26 }
 0x156   : > { %v793_v27 = vld [vmem:[%s350_s16] sm:$0x3] }
 0x157   : > { %v819_v28 = vsel %vm366_vm3, %v793_v27, inf  ;;  %v795_v29 = vsel %vm366_vm3, %v793_v27, -inf }
 0x158   : > { %820 = vmin.xlane.f32.xlu1 %v819_v28  ;;  %796 = vmax.xlane.f32.xlu0 %v795_v29 }
 0x15b   : > { %v733_v30 = vpop.f32.mrb[4].mxu0 }
 0x15c   : > { %v739_v32 = vpack.c.bf16 %v733_v30, %v733_v30  ;;  %v1102_v33 = vpop.f32.mrb[5].mxu0 }
 0x15d   : > { %v736_v34 = vpop.f32.mrb[6].mxu0 }
 0x15e   : > { %v1103_v35 = vpop.f32.mrb[7].mxu0  ;;  %1113 = vmatmul.mubr.msk.bf16.vlgmr.msra.gmra.mrb[12].mxu1 %vm740_vm4, %v739_v32 }
 0x1e5   : > { %v797_v36 = vpop.xlane.xlu0 %796  ;;  %v821_v53 = vpop.xlane.xlu1 %820 }
 0x1e6   : > { %v798_v37 = vrot.slane %v797_v36, 4  ;;  %v822_v54 = vrot.slane %v821_v53, 4 }
 0x1e8   : > { %v799_v38 = vmax.f32 %v797_v36, %v798_v37  ;;  %v823_v55 = vmin.f32 %v821_v53, %v822_v54 }
 0x1ea   : > { %v800_v39 = vrot.slane %v799_v38, 2  ;;  %v824_v56 = vrot.slane %v823_v55, 2 }
 0x1ec   : > { %v801_v41 = vmax.f32 %v799_v38, %v800_v39  ;;  %v825_v21 = vmin.f32 %v823_v55, %v824_v56 }
 0x1ee   : > { %v802_v42 = vrot.slane %v801_v41, 1  ;;  %v826_v4 = vrot.slane %v825_v21, 1 }
 0x1f0   : > { %v803_v43 = vmax.f32 %v801_v41, %v802_v42  ;;  %v827_v1 = vmin.f32 %v825_v21, %v826_v4 }
 0x1f2   : > { %1116 = vpush %v803_v43 }
 0x223   : > { %s1117_s19 = spop %1116 }
 0x231   : > { %v778_v46 = vpop.f32.mrb[12].mxu1 }
 0x232   : > { %v788_v47 = vadd.f32 %v787_v45, %v778_v46  ;;  %v1114_v48 = vpop.f32.mrb[13].mxu1 }
 0x233   : > { %v781_v50 = vpop.f32.mrb[14].mxu1 }
 0x234   : > { %789 = vst.msk [vmem:[%s354_s14] sm:$0x3] %vm366_vm3, %v788_v47  ;;  %v1115_v51 = vpop.f32.mrb[15].mxu1 }
 0x23b   : > { %v794_v40 = vld [vmem:[%s354_s14] sm:$0x3] }
 0x23c   : > { %v829_v52 = vsel %vm366_vm3, %v794_v40, inf  ;;  %v805_v0 = vsel %vm366_vm3, %v794_v40, -inf }
 0x23d   : > { %830 = vmin.xlane.f32.xlu1 %v829_v52  ;;  %806 = vmax.xlane.f32.xlu0 %v805_v0 }
 0x2ca   : > { %v831_v57 = vpop.xlane.xlu1 %830  ;;  %v807_v58 = vpop.xlane.xlu0 %806 }
 0x2cb   : > { %v832_v59 = vrot.slane %v831_v57, 4  ;;  %v808_v60 = vrot.slane %v807_v58, 4 }
 0x2cd   : > { %v833_v61 = vmin.f32 %v831_v57, %v832_v59  ;;  %v809_v17 = vmax.f32 %v807_v58, %v808_v60 }
 0x2cf   : > { %v834_v62 = vrot.slane %v833_v61, 2  ;;  %v810_v63 = vrot.slane %v809_v17, 2 }
 0x2d1   : > { %v835_v11 = vmin.f32 %v833_v61, %v834_v62  ;;  %v811_v8 = vmax.f32 %v809_v17, %v810_v63 }
 0x2d3   : > { %v812_v12 = vrot.slane %v811_v8, 1  ;;  %v836_v31 = vrot.slane %v835_v11, 1 }
 0x2d5   : > { %v813_v44 = vmax.f32 %v811_v8, %v812_v12  ;;  %v837_v49 = vmin.f32 %v835_v11, %v836_v31 }
 0x2d7   : > { %1118 = vpush %v813_v44 }
 0x2d8   : > { %1120 = vpush %v827_v1 }
 0x2d9   : > { %1122 = vpush %v837_v49 }
 0x308   : > { %s1119_s30 = spop %1118 }
 0x309   : > { %s815_s7 = smax.f32 %s1119_s30, %s1117_s19  ;;  %s1121_s10 = spop %1120 }
 0x30a   : > { %v816_v2 = vstv %s815_s7  ;;  %s1123_s27 = spop %1122 }
 0x30b   : > { %818 = vst.msk [vmem:[%s357_s11] sm:$0x1] %vm817_vm5, %v816_v2  ;;  %s839_s29 = smin.f32 %s1123_s27, %s1121_s10 }
 0x30c   : > { %v840_v3 = vstv %s839_s29 }
 0x30d   : > { %841 = vst.msk [vmem:[%s360_s20] sm:$0x1] %vm817_vm5, %v840_v3 }
 0x30e PF: > { %s23_s26 = sadd.s32 1, %s1302_s26   ;;  %s1690_s21 = smov %s1286_s22 }
 0x30f   : > { %p20_p11 = scmp.ge.s32.totalorder %s23_s26, 4   ;;  %s1691_s22 = smov %s1290_s23 }
 0x310   : > { %s1692_s23 = smov %s1394_s9  ;;  %s1693_s24 = smov %s1298_s25 }
 0x311   : > { %s1694_s25 = smov %s1696_s28  ;;  %22 = sbr.rel (!%p20_p11) target bundleno = 6 (0x6), region = 129 }
 0x318   :  { %899 = vsyncpa [#allocation3], 1 }
 0x319   :  { %901 = vsyncpa [#allocation3 + $0x1], 1 }
 0x31a   :  { %902 = vsyncpa [#allocation5], 1 }
 0x31b   :  { %904 = vsyncpa [#allocation5 + $0x1], 1 }

</bundles_post_ra>
